<compile_context>
chip_gen: v7x
topology: tpu7x:2x2x1
jax: 0.10.0
libtpu: 0.0.40
codegen_flags: <defaults>
</compile_context>

<pallas_src>
import functools

import numpy as np
import jax
import jax.numpy as jnp
from jax.experimental import pallas as pl
from jax.experimental.pallas import tpu as pltpu


def _round_up(x, m):
    return ((x + m - 1) // m) * m


def _layer_gather_constants(depth, n_tree, n_leaf, tlp):
    """Per-layer column-gather indices + signs (host-side numpy, built once).

    For layer l, the decision routed to leaf `leaf` of tree `t` is column
    `t*n_leaf + node(l, leaf)` of the fused decision matrix, used as d if the
    path goes left (bit==0) or as (1 - d) if it goes right (bit==1).  Since
    1 - sigmoid(z) == sigmoid(-z), the right branch is realized by negating
    the corresponding weight/bias columns (sign = -1).  Padded lanes
    (col >= n_tree*n_leaf) get sign 0 -> sigmoid(0) = 0.5, which is harmless
    because the matching rows of the pi matrix are zero.
    """
    idx = np.zeros((depth, tlp), np.int32)
    sgn = np.zeros((depth, tlp), np.float32)
    for l in range(depth):
        stride = 2 ** (depth - l)
        for t in range(n_tree):
            for leaf in range(n_leaf):
                col = t * n_leaf + leaf
                idx[l, col] = t * n_leaf + 2 ** l + leaf // stride
                bit = (leaf // (stride // 2)) % 2
                sgn[l, col] = 1.0 - 2.0 * float(bit)
    return idx.reshape(-1), sgn.reshape(1, -1)


def _forest_kernel(x_ref, w_ref, b_ref, p_ref, out_ref, *, depth, tlp):
    """One grid step == one batch tile; all trees & layers fused on the lane axis."""
    # Every (tree, layer, leaf) decision in a single lane-dense matmul:
    # [Bt, F] @ [F, depth*TLp]  (+ f32 bias), sigmoid on the EUP.
    z = jnp.dot(x_ref[...], w_ref[...], preferred_element_type=jnp.float32)
    d = jax.nn.sigmoid(z + b_ref[...])                      # [Bt, depth*TLp] f32

    # Routing probabilities: product of the per-layer slices (pure VPU work,
    # static lane slices on 128-aligned boundaries).
    mu = d[:, :tlp]
    for l in range(1, depth):
        mu = mu * d[:, l * tlp:(l + 1) * tlp]               # [Bt, TLp]

    # pi is pre-softmaxed and pre-scaled by 1/n_tree, so one matmul yields the
    # tree-averaged class probabilities (lane-padded output, unmasked stores).
    out_ref[...] = jnp.dot(mu.astype(p_ref.dtype), p_ref[...],
                           preferred_element_type=jnp.float32)


@functools.partial(jax.jit, static_argnames=("depth", "block_b", "use_bf16"))
def forest_forward(x, masks, ws, bs, pis, *, depth, block_b=None, use_bf16=False):
    B, F = x.shape
    T = masks.shape[0]
    L = 2 ** depth
    C = pis.shape[-1]
    TL = T * L
    TLp = max(128, _round_up(TL, 128))     # lane-dense decision / mu width
    Cp = max(128, _round_up(C, 128))       # lane-dense output width (unmasked vst)

    if block_b is None:
        block_b = 256 if B >= 256 else _round_up(B, 16)
    block_b = max(16, _round_up(block_b, 16))
    Bp = _round_up(B, block_b)             # pad batch: any B works

    # ---- wrapper-side preprocessing (plain XLA, once per call) ----
    # (1) Fold the 0/1 feature-selection masks into the decision weights and
    #     concatenate all trees along the lane axis.
    w_eff = jnp.einsum('tfu,tul->tfl', masks, ws)            # [T, F, L]
    w_all = jnp.transpose(w_eff, (1, 0, 2)).reshape(F, TL)
    w_all = jnp.pad(w_all, ((0, 0), (0, TLp - TL)))          # [F, TLp]
    b_all = jnp.pad(bs.reshape(1, TL), ((0, 0), (0, TLp - TL)))

    # (2) Fold the one-hot routing matrices E[l] AND the left/right bit into
    #     per-layer weight/bias columns (column gather + sign), eliminating the
    #     [TLp,TLp] expand matmuls and the bit/sign constants from the kernel.
    idx, sgn = _layer_gather_constants(depth, T, L, TLp)
    sgn = jnp.asarray(sgn)
    w_layers = w_all[:, idx] * sgn                           # [F, depth*TLp]
    b_layers = b_all[:, idx] * sgn                           # [1, depth*TLp]

    # (3) softmax(pi), pre-scaled by 1/n_tree; zero rows kill padded mu lanes.
    pi_soft = jax.nn.softmax(pis, axis=-1) / T               # [T, L, C]
    p_all = jnp.pad(pi_soft.reshape(TL, C), ((0, TLp - TL), (0, Cp - C)))

    # (4) Optional bf16 MXU inputs; accumulation, bias, sigmoid, product stay f32.
    if use_bf16:
        xk = x.astype(jnp.bfloat16)
        w_layers = w_layers.astype(jnp.bfloat16)
        p_all = p_all.astype(jnp.bfloat16)
    else:
        xk = x
    if Bp != B:
        xk = jnp.pad(xk, ((0, Bp - B), (0, 0)))

    # Explicit scoped-VMEM budget: residents (double-buffered by default) +
    # streamed tiles + in-kernel temporaries, with headroom; clamped so it is
    # valid on every generation (v7x physical VMEM is 64 MiB).
    wbytes = 2 if use_bf16 else 4
    resident = F * depth * TLp * wbytes + depth * TLp * 4 + TLp * Cp * wbytes
    streamed = block_b * F * wbytes + block_b * Cp * 4
    temps = block_b * (depth + 1) * TLp * 4
    vmem_limit = int(min(64 * 1024 * 1024,
                         max(32 * 1024 * 1024,
                             2 * (resident + streamed + temps) + (8 << 20))))

    kernel = functools.partial(_forest_kernel, depth=depth, tlp=TLp)
    out = pl.pallas_call(
        kernel,
        out_shape=jax.ShapeDtypeStruct((Bp, Cp), jnp.float32),
        grid_spec=pltpu.PrefetchScalarGridSpec(
            num_scalar_prefetch=0,
            grid=(Bp // block_b,),
            in_specs=[
                pl.BlockSpec((block_b, F), lambda i: (i, 0)),        # x: batch tiles
                pl.BlockSpec((F, depth * TLp), lambda i: (0, 0)),    # fused per-layer weights (resident)
                pl.BlockSpec((1, depth * TLp), lambda i: (0, 0)),    # fused per-layer bias    (resident)
                pl.BlockSpec((TLp, Cp), lambda i: (0, 0)),           # softmax(pi)/n_tree      (resident)
            ],
            out_specs=pl.BlockSpec((block_b, Cp), lambda i: (i, 0)),
        ),
        compiler_params=pltpu.CompilerParams(
            dimension_semantics=("parallel",),        # batch tiles shard across v7x's 2 TCs
            vmem_limit_bytes=vmem_limit),
    )(xk, w_layers, b_layers, p_all)
    return out[:B, :C]


def forest_ref(x, masks, ws, bs, pis, *, depth):
    """Pure-JAX port of the PyTorch Forest/Tree forward (for verification)."""
    T = masks.shape[0]
    B = x.shape[0]
    probs = []
    for t in range(T):
        feats = x @ masks[t]
        decision = jax.nn.sigmoid(feats @ ws[t] + bs[t, 0])          # [B, L]
        dec2 = jnp.stack([decision, 1.0 - decision], axis=2)         # [B, L, 2]
        mu = jnp.ones((B, 1, 1), jnp.float32)
        begin = 1
        for l in range(depth):
            n = 2 ** l
            mu = jnp.repeat(mu.reshape(B, -1, 1), 2, axis=2)
            mu = mu * dec2[:, begin:begin + n, :]
            begin += n
        mu = mu.reshape(B, -1)
        pi_soft = jax.nn.softmax(pis[t], axis=-1)
        probs.append(mu @ pi_soft)
    return sum(probs) / T


if __name__ == "__main__":
    # Small, forward-consistent shapes. B is deliberately not a multiple of the
    # batch tile so the padding path is exercised; block_b=128 gives a 2-step
    # parallel grid (both v7x TensorCores get work).
    B = 200               # batch
    F = 32                # n_in_feature
    T = 4                 # n_tree
    depth = 3             # tree_depth  -> n_leaf = 8
    rate = 0.5            # tree_feature_rate -> n_used_feature = 16
    C = 4                 # n_class
    U = int(F * rate)
    L = 2 ** depth

    key = jax.random.PRNGKey(0)
    kx, kperm, kw, kb, kpi = jax.random.split(key, 5)

    x = jax.random.normal(kx, (B, F), jnp.float32)

    # Per-tree random feature subset -> one-hot mask [F, U] (Tree.feature_mask)
    eye = jnp.eye(F, dtype=jnp.float32)
    masks = []
    for pk in jax.random.split(kperm, T):
        sel = jax.random.permutation(pk, F)[:U]
        masks.append(eye[sel].T)
    masks = jnp.stack(masks)                                         # [T, F, U]

    # Tree.decision = Linear(U, L) + Sigmoid (weights stored transposed [U, L])
    bound = 1.0 / (U ** 0.5)
    ws = jax.random.uniform(kw, (T, U, L), jnp.float32, -bound, bound)
    bs = jax.random.uniform(kb, (T, 1, L), jnp.float32, -bound, bound)

    # Tree.pi (jointly_training=True): uniform [0,1) like np.random.rand
    pis = jax.random.uniform(kpi, (T, L, C), jnp.float32)

    ref = forest_ref(x, masks, ws, bs, pis, depth=depth)

    # f32 MXU-input path: exact (1e-5) check against the reference.
    out = jax.block_until_ready(
        forest_forward(x, masks, ws, bs, pis, depth=depth, block_b=128))
    assert out.shape == (B, C)
    assert jnp.allclose(out, ref, rtol=1e-5, atol=1e-5)

    # bf16 MXU-input path (v5e/v6e/v7x throughput): f32 accumulation, looser tol.
    out_bf16 = jax.block_until_ready(
        forest_forward(x, masks, ws, bs, pis, depth=depth, block_b=128,
                       use_bf16=True))
    assert out_bf16.shape == (B, C)
    assert jnp.allclose(out_bf16, ref, rtol=2e-2, atol=2e-2)

    print("KERNEL_OK")
</pallas_src>

<mosaic_0001>
module attributes {stable_mosaic.version = 11 : i64} {
  func.func @_forest_kernel(%arg0: i32, %arg1: memref<128x32xf32, #tpu.memory_space<vmem>>, %arg2: memref<32x384xf32, #tpu.memory_space<vmem>>, %arg3: memref<1x384xf32, #tpu.memory_space<vmem>>, %arg4: memref<128x128xf32, #tpu.memory_space<vmem>>, %arg5: memref<128x128xf32, #tpu.memory_space<vmem>>) attributes {dimension_semantics = [#tpu.dimension_semantics<parallel>], iteration_bounds = array<i64: 2>, scalar_prefetch = 0 : i64, scratch_operands = 0 : i64, tpu.core_type = #tpu.core_type<tc>, window_params = [{transform_indices = @transform_0, window_bounds = array<i64: 128, 32>}, {pipeline_mode = #tpu.pipeline_mode<synchronous>, transform_indices = @transform_1, window_bounds = array<i64: 32, 384>}, {pipeline_mode = #tpu.pipeline_mode<synchronous>, transform_indices = @transform_2, window_bounds = array<i64: 1, 384>}, {pipeline_mode = #tpu.pipeline_mode<synchronous>, transform_indices = @transform_3, window_bounds = array<i64: 128, 128>}, {transform_indices = @transform_4, window_bounds = array<i64: 128, 128>}]} {
    %c0 = arith.constant 0 : index
    %c0_0 = arith.constant 0 : index
    %0 = vector.load %arg1[%c0, %c0_0] : memref<128x32xf32, #tpu.memory_space<vmem>>, vector<128x32xf32>
    %c0_1 = arith.constant 0 : index
    %c0_2 = arith.constant 0 : index
    %1 = vector.load %arg2[%c0_1, %c0_2] : memref<32x384xf32, #tpu.memory_space<vmem>>, vector<32x384xf32>
    %cst = arith.constant dense<0.000000e+00> : vector<128x384xf32>
    %2 = tpu.matmul %0, %1, %cst {dimension_numbers = #tpu.dot_dimension_numbers<[1], [0], [0], [1], [0, 0, 1, 1], [], []>} : vector<128x32xf32>, vector<32x384xf32>, vector<128x384xf32> -> vector<128x384xf32>
    %c0_3 = arith.constant 0 : index
    %c0_4 = arith.constant 0 : index
    %3 = vector.load %arg3[%c0_3, %c0_4] : memref<1x384xf32, #tpu.memory_space<vmem>>, vector<1x384xf32>
    %4 = vector.broadcast %3 : vector<1x384xf32> to vector<128x384xf32>
    %5 = arith.addf %2, %4 : vector<128x384xf32>
    %6 = arith.negf %5 : vector<128x384xf32>
    %7 = math.exp %6 : vector<128x384xf32>
    %cst_5 = arith.constant 1.000000e+00 : f32
    %8 = vector.broadcast %cst_5 : f32 to vector<128x384xf32>
    %9 = arith.addf %8, %7 : vector<128x384xf32>
    %10 = arith.divf %8, %9 : vector<128x384xf32>
    %11 = vector.extract_strided_slice %10 {offsets = [0, 0], sizes = [128, 128], strides = [1, 1]} : vector<128x384xf32> to vector<128x128xf32>
    %12 = vector.extract_strided_slice %10 {offsets = [0, 128], sizes = [128, 128], strides = [1, 1]} : vector<128x384xf32> to vector<128x128xf32>
    %13 = arith.mulf %11, %12 : vector<128x128xf32>
    %14 = vector.extract_strided_slice %10 {offsets = [0, 256], sizes = [128, 128], strides = [1, 1]} : vector<128x384xf32> to vector<128x128xf32>
    %15 = arith.mulf %13, %14 : vector<128x128xf32>
    %c0_6 = arith.constant 0 : index
    %c0_7 = arith.constant 0 : index
    %16 = vector.load %arg4[%c0_6, %c0_7] : memref<128x128xf32, #tpu.memory_space<vmem>>, vector<128x128xf32>
    %cst_8 = arith.constant dense<0.000000e+00> : vector<128x128xf32>
    %17 = tpu.matmul %15, %16, %cst_8 {dimension_numbers = #tpu.dot_dimension_numbers<[1], [0], [0], [1], [0, 0, 1, 1], [], []>} : vector<128x128xf32>, vector<128x128xf32>, vector<128x128xf32> -> vector<128x128xf32>
    %c0_9 = arith.constant 0 : index
    %c0_10 = arith.constant 0 : index
    %18 = vector.load %arg5[%c0_9, %c0_10] : memref<128x128xf32, #tpu.memory_space<vmem>>, vector<128x128xf32>
    tpu.vector_store %arg5[%c0_9, %c0_10], %17 {strides = array<i32>} : memref<128x128xf32, #tpu.memory_space<vmem>>, vector<128x128xf32>,
    return
  }
  func.func @transform_0(%arg0: i32) -> (i32, i32) {
    %c0_i32 = arith.constant 0 : i32
    %c0_i32_0 = arith.constant 0 : i32
    return %arg0, %c0_i32 : i32, i32
  }
  func.func @transform_1(%arg0: i32) -> (i32, i32) {
    %c0_i32 = arith.constant 0 : i32
    %c0_i32_0 = arith.constant 0 : i32
    %c0_i32_1 = arith.constant 0 : i32
    return %c0_i32, %c0_i32_0 : i32, i32
  }
  func.func @transform_2(%arg0: i32) -> (i32, i32) {
    %c0_i32 = arith.constant 0 : i32
    %c0_i32_0 = arith.constant 0 : i32
    %c0_i32_1 = arith.constant 0 : i32
    return %c0_i32, %c0_i32_0 : i32, i32
  }
  func.func @transform_3(%arg0: i32) -> (i32, i32) {
    %c0_i32 = arith.constant 0 : i32
    %c0_i32_0 = arith.constant 0 : i32
    %c0_i32_1 = arith.constant 0 : i32
    return %c0_i32, %c0_i32_0 : i32, i32
  }
  func.func @transform_4(%arg0: i32) -> (i32, i32) {
    %c0_i32 = arith.constant 0 : i32
    %c0_i32_0 = arith.constant 0 : i32
    return %arg0, %c0_i32 : i32, i32
  }
}

</mosaic_0001>

<bundles_post_ra>
// kernel: mul.13
= control target key start
LH: loop header
LB: loop body
LE: loop exit
PB: predicated region body
PF: predicated region fallthrough
CT: control target
= control target key end

     0   :  { %s34_s0 = inlined_call_operand.vmem [shape: f32[384], index: 0, kind: input, shape index: {}]   ;;  %s35_s1 = inlined_call_operand.vmem [shape: f32[384], index: 1, kind: input, shape index: {}]   ;;  %s36_s2 = inlined_call_operand.vmem [shape: f32[384], index: 2, kind: output, shape index: {}]  }
   0x1   :  { %v3_v0 = vld [vmem:[%s34_s0] sm:$0x7] }
   0x2   :  { %v4_v1 = vld [vmem:[%s35_s1] sm:$0x7] }
   0x3   :  { %v7_v2 = vmul.f32 %v4_v1, %v3_v0 }
   0x5   :  { %9 = vst [vmem:[%s36_s2] sm:$0xf] %v7_v2 }

// kernel: forest_forward.1
= control target key start
LH: loop header
LB: loop body
LE: loop exit
PB: predicated region body
PF: predicated region fallthrough
CT: control target
= control target key end

     0   :  { %s1668_s15 = smov 0   ;;  %s1983_s0 = inlined_call_operand.vmem [shape: f32[256,32], index: 0, kind: input, shape index: {}]   ;;  %s1984_s1 = inlined_call_operand.vmem [shape: f32[32,384], index: 1, kind: input, shape index: {}]   ;;  %s1985_s2 = inlined_call_operand.vmem [shape: f32[1,384], index: 2, kind: input, shape index: {}]   ;;  %s1986_s3 = inlined_call_operand.vmem [shape: f32[128,128], index: 3, kind: input, shape index: {}]   ;;  %s1987_s4 = inlined_call_operand.vmem [shape: f32[256,128], index: 4, kind: output, shape index: {}]  }
   0x1 LB: > { %s1154_s16 = sadd.s32 4294967295, %s1640_s15   ;;  %p1158_p0 = scmp.ge.s32.totalorder %s1640_s15, 1  ;;  %s1640_s15 = sphi %s1668_s15, %s14_s15  }
   0x2   : > { %p163_p1 = scmp.lt.s32.totalorder %s1640_s15, 3 }
   0x4   : > { %p164_p2 = pnand %p1158_p0, %p163_p1 }
   0x5   : > { %v218_v0 = vld [vmem:[%s1984_s1 + $0x8] sm:$0xff] (!%p164_p2)  ;;  %v221_v1 = vld [vmem:[%s1984_s1 + $0x20] sm:$0xff] (!%p164_p2)  ;;  %s1159_s23 = sshll.u32 (!%p164_p2), %s1154_s16, 4  ;;  %v220_v4 = vld [vmem:[%s1984_s1 + $0x18] sm:$0xff] (!%p164_p2)  ;;  %v1642_v7 = vmov (!%p164_p2), 0.0   ;;  %vm246_vm0 = vcmask (!%p164_p2), 261120   ;;  %v231_v59 = vlaneseq (!%p164_p2) }
   0x6   : > { %167 = sbr.rel (%p164_p2) target bundleno = 560 (0x230), region = 36  ;;  %v217_v2 = vld [vmem:[%s1984_s1] sm:$0xff] (!%p164_p2)  ;;  %v1385_v3 = vpack.c.bf16 (!%p164_p2), %v221_v1, %v218_v0  ;;  %v219_v5 = vld [vmem:[%s1984_s1 + $0x10] sm:$0xff] (!%p164_p2)  ;;  %v222_v6 = vld [vmem:[%s1984_s1 + $0x28] sm:$0xff] (!%p164_p2)  ;;  %359 = vmatprep.mubr.f32.mxu0 (!%p164_p2), %v1642_v7  ;;  %p190_p3 = scmp.lt.s32.totalorder (!%p164_p2), %s1159_s23, 31 }
   0x7   : > { %v1387_v8 = vpack.c.bf16 (!%p164_p2), %v220_v4, %v217_v2  ;;  %v1393_v9 = vpack.c.bf16 (!%p164_p2), %v222_v6, %v219_v5  ;;  %v224_v10 = vld [vmem:[%s1984_s1 + $0x38] sm:$0xff] (!%p164_p2)  ;;  %v227_v11 = vld [vmem:[%s1984_s1 + $0x50] sm:$0xff] (!%p164_p2)  ;;  %v226_v14 = vld [vmem:[%s1984_s1 + $0x48] sm:$0xff] (!%p164_p2)  ;;  %v232_v60 = vshrl.u32 (!%p164_p2), %v231_v59, 7 }
   0x8   : > { %v223_v12 = vld [vmem:[%s1984_s1 + $0x30] sm:$0xff] (!%p164_p2)  ;;  %1386 = vmatprep.subr.bf16.mxu0 (!%p164_p2), %v1385_v3  ;;  %v1389_v13 = vpack.c.bf16 (!%p164_p2), %v227_v11, %v224_v10  ;;  %v225_v15 = vld [vmem:[%s1984_s1 + $0x40] sm:$0xff] (!%p164_p2)  ;;  %v228_v16 = vld [vmem:[%s1984_s1 + $0x58] sm:$0xff] (!%p164_p2) }
   0x9   : > { %1388 = vmatpush1.bf16.msra.mxu0 (!%p164_p2), %v1387_v8  ;;  %1394 = vmatprep.subr.bf16.mxu1 (!%p164_p2), %v1393_v9  ;;  %v1391_v17 = vpack.c.bf16 (!%p164_p2), %v226_v14, %v223_v12  ;;  %v1397_v18 = vpack.c.bf16 (!%p164_p2), %v228_v16, %v225_v15  ;;  %v921_v35 = vld [vmem:[%s1986_s3] sm:$0xff] (!%p164_p2)  ;;  %v922_v36 = vld [vmem:[%s1986_s3 + $0x8] sm:$0xff] (!%p164_p2)  ;;  %v923_v38 = vld [vmem:[%s1986_s3 + $0x10] sm:$0xff] (!%p164_p2)  ;;  %v233_v61 = vsub.s32 (!%p164_p2), 0, %v232_v60  ;;  %v237_v63 = vsub.s32 (!%p164_p2), 1, %v232_v60 }
   0xa   : > { %1396 = vmatpush3.bf16.msra.mxu1 (!%p164_p2), %v1393_v9  ;;  %1390 = vmatprep.subr.bf16.mxu0 (!%p164_p2), %v1389_v13  ;;  %v1401_v37 = vpack.c.bf16 (!%p164_p2), %v922_v36, %v921_v35  ;;  %v924_v39 = vld [vmem:[%s1986_s3 + $0x18] sm:$0xff] (!%p164_p2)  ;;  %v925_v41 = vld [vmem:[%s1986_s3 + $0x20] sm:$0xff] (!%p164_p2)  ;;  %v926_v42 = vld [vmem:[%s1986_s3 + $0x28] sm:$0xff] (!%p164_p2)  ;;  %v241_v0 = vsub.s32 (!%p164_p2), 2, %v232_v60 }
   0xb   : > { %1398 = vmatprep.subr.bf16.mxu1 (!%p164_p2), %v1397_v18  ;;  %v1405_v40 = vpack.c.bf16 (!%p164_p2), %v924_v39, %v923_v38  ;;  %v1409_v43 = vpack.c.bf16 (!%p164_p2), %v926_v42, %v925_v41  ;;  %v927_v44 = vld [vmem:[%s1986_s3 + $0x30] sm:$0xff] (!%p164_p2)  ;;  %v928_v45 = vld [vmem:[%s1986_s3 + $0x38] sm:$0xff] (!%p164_p2)  ;;  %v929_v47 = vld [vmem:[%s1986_s3 + $0x40] sm:$0xff] (!%p164_p2) }
   0xc   : > { %v1413_v46 = vpack.c.bf16 (!%p164_p2), %v928_v45, %v927_v44  ;;  %v930_v48 = vld [vmem:[%s1986_s3 + $0x48] sm:$0xff] (!%p164_p2)  ;;  %v931_v50 = vld [vmem:[%s1986_s3 + $0x50] sm:$0xff] (!%p164_p2)  ;;  %v932_v51 = vld [vmem:[%s1986_s3 + $0x58] sm:$0xff] (!%p164_p2) }
   0xd   : > { %s1989_s23 = smov (!%p190_p3, %s1159_s23), 31  ;;  %1392 = vmatpush1.bf16.msra.mxu0 %v1391_v17  ;;  %v1417_v49 = vpack.c.bf16 %v930_v48, %v929_v47  ;;  %v1421_v52 = vpack.c.bf16 %v932_v51, %v931_v50  ;;  %v933_v53 = vld [vmem:[%s1986_s3 + $0x60] sm:$0xff]  ;;  %v934_v54 = vld [vmem:[%s1986_s3 + $0x68] sm:$0xff]  ;;  %v935_v56 = vld [vmem:[%s1986_s3 + $0x70] sm:$0xff] }
   0xe   : > { %s1160_s17 = sshll.u32 %s1989_s23, 3  ;;  %1400 = vmatpush3.bf16.msra.mxu1 %v1397_v18  ;;  %v1425_v55 = vpack.c.bf16 %v934_v54, %v933_v53  ;;  %v936_v57 = vld [vmem:[%s1986_s3 + $0x78] sm:$0xff]  ;;  %v229_v62 = vld [vmem:[%s1985_s2] sm:$0x7] }
   0xf   : > { %s1721_s20 = scalar_lea.vmem %s1983_s0, %s1160_s17  ;;  %1402 = vmatprep.subr.bf16.mxu1 %v1401_v37  ;;  %v1429_v58 = vpack.c.bf16 %v936_v57, %v935_v56  ;;  %v1837_v1 = vrot.slane %v229_v62, %v233_v61  ;;  %v1839_v2 = vrot.slane %v229_v62, %v237_v63  ;;  %v1841_v3 = vrot.slane %v229_v62, %v241_v0  ;;  %s1962_s9 = scalar_lea.vmem %s1987_s4, %s1160_s17 }
  0x10   : > { %v201_v19 = vld [vmem:[%s1721_s20] sm:$0xff]  ;;  %v202_v20 = vld [vmem:[%s1721_s20 + $0x8] sm:$0xff]  ;;  %v203_v21 = vld [vmem:[%s1721_s20 + $0x10] sm:$0xff] }
  0x11   : > { %1305 = vmatprep.mubr.msk.f32.mxu1 %vm246_vm0, %v201_v19  ;;  %1163 = vmatmul.mubr.msk.f32.vlgmr.msra.gmra.mrb[0].mxu0 %vm246_vm0, %v201_v19  ;;  %v204_v22 = vld [vmem:[%s1721_s20 + $0x18] sm:$0xff]  ;;  %v205_v23 = vld [vmem:[%s1721_s20 + $0x20] sm:$0xff]  ;;  %v206_v24 = vld [vmem:[%s1721_s20 + $0x28] sm:$0xff] }
  0x12   : > { %1306 = vmatmul.mubr.msk.f32.vlgmr.msra.gmra.mrb[0].mxu1 %vm246_vm0, %v202_v20  ;;  %365 = vmatprep.mubr.f32.mxu0 %v1642_v7  ;;  %v207_v25 = vld [vmem:[%s1721_s20 + $0x30] sm:$0xff]  ;;  %v208_v26 = vld [vmem:[%s1721_s20 + $0x38] sm:$0xff]  ;;  %v209_v27 = vld [vmem:[%s1721_s20 + $0x40] sm:$0xff] }
  0x13   : > { %1308 = vmatprep.mubr.msk.f32.mxu1 %vm246_vm0, %v203_v21  ;;  %v210_v28 = vld [vmem:[%s1721_s20 + $0x48] sm:$0xff]  ;;  %v211_v29 = vld [vmem:[%s1721_s20 + $0x50] sm:$0xff]  ;;  %v212_v30 = vld [vmem:[%s1721_s20 + $0x58] sm:$0xff]  ;;  %1404 = vmatpush3.bf16.msra.mxu1 %v1401_v37 }
  0x14   : > { %v213_v31 = vld [vmem:[%s1721_s20 + $0x60] sm:$0xff]  ;;  %v214_v32 = vld [vmem:[%s1721_s20 + $0x68] sm:$0xff]  ;;  %v215_v33 = vld [vmem:[%s1721_s20 + $0x70] sm:$0xff]  ;;  %1406 = vmatprep.subr.bf16.mxu1 %v1405_v40 }
  0x15   : > { %1164 = vmatmul.mubr.msk.f32.gmra.mrb[2].mxu0 %vm246_vm0, %v202_v20  ;;  %v216_v34 = vld [vmem:[%s1721_s20 + $0x78] sm:$0xff] }
  0x16   : > { %371 = vmatprep.mubr.f32.mxu0 %v1642_v7  ;;  %1309 = vmatmul.mubr.msk.f32.gmra.mrb[2].mxu1 %vm246_vm0, %v204_v22 }
  0x17   : > { %1311 = vmatprep.mubr.msk.f32.mxu1 %vm246_vm0, %v205_v23  ;;  %1408 = vmatpush3.bf16.msra.mxu1 %v1405_v40 }
  0x18   : > { %1410 = vmatprep.subr.bf16.mxu1 %v1409_v43 }
  0x19   : > { %1165 = vmatmul.mubr.msk.f32.gmra.mrb[4].mxu0 %vm246_vm0, %v203_v21 }
  0x1a   : > { %377 = vmatprep.mubr.f32.mxu0 %v1642_v7  ;;  %1312 = vmatmul.mubr.msk.f32.gmra.mrb[4].mxu1 %vm246_vm0, %v206_v24 }
  0x1b   : > { %1314 = vmatprep.mubr.msk.f32.mxu1 %vm246_vm0, %v207_v25  ;;  %1412 = vmatpush3.bf16.msra.mxu1 %v1409_v43 }
  0x1c   : > { %1414 = vmatprep.subr.bf16.mxu1 %v1413_v46 }
  0x1d   : > { %1166 = vmatmul.mubr.msk.f32.gmra.mrb[6].mxu0 %vm246_vm0, %v204_v22 }
  0x1e   : > { %383 = vmatprep.mubr.f32.mxu0 %v1642_v7  ;;  %1315 = vmatmul.mubr.msk.f32.gmra.mrb[6].mxu1 %vm246_vm0, %v208_v26 }
  0x1f   : > { %1317 = vmatprep.mubr.msk.f32.mxu1 %vm246_vm0, %v209_v27  ;;  %1416 = vmatpush3.bf16.msra.mxu1 %v1413_v46 }
  0x20   : > { %1418 = vmatprep.subr.bf16.mxu1 %v1417_v49 }
  0x21   : > { %1167 = vmatmul.mubr.msk.f32.gmra.mrb[8].mxu0 %vm246_vm0, %v205_v23 }
  0x22   : > { %389 = vmatprep.mubr.f32.mxu0 %v1642_v7  ;;  %1318 = vmatmul.mubr.msk.f32.gmra.mrb[8].mxu1 %vm246_vm0, %v210_v28 }
  0x23   : > { %1320 = vmatprep.mubr.msk.f32.mxu1 %vm246_vm0, %v211_v29  ;;  %1420 = vmatpush3.bf16.msra.mxu1 %v1417_v49 }
  0x24   : > { %1422 = vmatprep.subr.bf16.mxu1 %v1421_v52 }
  0x25   : > { %1168 = vmatmul.mubr.msk.f32.gmra.mrb[10].mxu0 %vm246_vm0, %v206_v24 }
  0x26   : > { %395 = vmatprep.mubr.f32.mxu0 %v1642_v7  ;;  %1321 = vmatmul.mubr.msk.f32.gmra.mrb[10].mxu1 %vm246_vm0, %v212_v30 }
  0x27   : > { %1323 = vmatprep.mubr.msk.f32.mxu1 %vm246_vm0, %v213_v31  ;;  %1424 = vmatpush3.bf16.msra.mxu1 %v1421_v52 }
  0x28   : > { %1426 = vmatprep.subr.bf16.mxu1 %v1425_v55 }
  0x29   : > { %1169 = vmatmul.mubr.msk.f32.gmra.mrb[12].mxu0 %vm246_vm0, %v207_v25 }
  0x2a   : > { %401 = vmatprep.mubr.f32.mxu0 %v1642_v7  ;;  %1324 = vmatmul.mubr.msk.f32.gmra.mrb[12].mxu1 %vm246_vm0, %v214_v32 }
  0x2b   : > { %1326 = vmatprep.mubr.msk.f32.mxu1 %vm246_vm0, %v215_v33  ;;  %1428 = vmatpush3.bf16.msra.mxu1 %v1425_v55 }
  0x2c   : > { %1430 = vmatprep.subr.bf16.mxu1 %v1429_v58 }
  0x2d   : > { %1170 = vmatmul.mubr.msk.f32.gmra.mrb[14].mxu0 %vm246_vm0, %v208_v26 }
  0x2e   : > { %407 = vmatprep.mubr.f32.mxu0 %v1642_v7  ;;  %1327 = vmatmul.mubr.msk.f32.gmra.mrb[14].mxu1 %vm246_vm0, %v216_v34 }
  0x2f   : > { %1432 = vmatpush3.bf16.msra.mxu1 %v1429_v58 }
  0x31   : > { %1171 = vmatmul.mubr.msk.f32.gmra.mrb[16].mxu0 %vm246_vm0, %v209_v27 }
  0x32   : > { %413 = vmatprep.mubr.f32.mxu0 %v1642_v7 }
  0x35   : > { %1172 = vmatmul.mubr.msk.f32.gmra.mrb[18].mxu0 %vm246_vm0, %v210_v28 }
  0x36   : > { %419 = vmatprep.mubr.f32.mxu0 %v1642_v7 }
  0x39   : > { %1173 = vmatmul.mubr.msk.f32.gmra.mrb[20].mxu0 %vm246_vm0, %v211_v29 }
  0x3a   : > { %425 = vmatprep.mubr.f32.mxu0 %v1642_v7 }
  0x3d   : > { %1174 = vmatmul.mubr.msk.f32.gmra.mrb[22].mxu0 %vm246_vm0, %v212_v30 }
  0x3e   : > { %431 = vmatprep.mubr.f32.mxu0 %v1642_v7 }
  0x41   : > { %1175 = vmatmul.mubr.msk.f32.gmra.mrb[24].mxu0 %vm246_vm0, %v213_v31 }
  0x42   : > { %437 = vmatprep.mubr.f32.mxu0 %v1642_v7 }
  0x45   : > { %1176 = vmatmul.mubr.msk.f32.gmra.mrb[26].mxu0 %vm246_vm0, %v214_v32 }
  0x46   : > { %443 = vmatprep.mubr.f32.mxu0 %v1642_v7 }
  0x49   : > { %1177 = vmatmul.mubr.msk.f32.gmra.mrb[28].mxu0 %vm246_vm0, %v215_v33 }
  0x4a   : > { %449 = vmatprep.mubr.f32.mxu0 %v1642_v7 }
  0x4d   : > { %1178 = vmatmul.mubr.msk.f32.gmra.mrb[30].mxu0 %vm246_vm0, %v216_v34 }
  0xe4   : > { %v361_v4 = vpop.f32.mrb[0].mxu0 }
  0xe5   : > { %v362_v5 = vadd.f32 %v361_v4, %v1837_v1  ;;  %v363_v6 = vpop.f32.mrb[1].mxu0  ;;  %v1307_v7 = vpop.f32.mrb[0].mxu1 }
  0xe6   : > { %v364_v8 = vadd.f32 %v363_v6, %v1839_v2  ;;  %v528_v9 = vadd.f32 %v1307_v7, %v1841_v3  ;;  %v522_v10 = vpop.f32.mrb[1].mxu1 }
  0xe7   : > { %v1195_v11 = vmul.f32 -1.442695, %v362_v5  ;;  %v523_v12 = vadd.f32 %v522_v10, %v1841_v3 }
  0xe8   : > { %v1196_v13 = vmul.f32 -1.442695, %v364_v8  ;;  %v1200_v14 = vmul.f32 -1.442695, %v528_v9  ;;  %v367_v15 = vpop.f32.mrb[2].mxu0 }
  0xe9   : > { %1442 = vpow2.f32 %v1195_v11  ;;  %v1197_v16 = vmul.f32 -1.442695, %v523_v12  ;;  %v368_v17 = vadd.f32 %v367_v15, %v1837_v1  ;;  %v369_v18 = vpop.f32.mrb[3].mxu0  ;;  %v1310_v19 = vpop.f32.mrb[2].mxu1 }
  0xea   : > { %1444 = vpow2.f32 %v1196_v13  ;;  %v370_v20 = vadd.f32 %v369_v18, %v1839_v2  ;;  %v538_v21 = vadd.f32 %v1310_v19, %v1841_v3  ;;  %v532_v22 = vpop.f32.mrb[3].mxu1 }
  0xeb   : > { %1446 = vpow2.f32 %v1200_v14  ;;  %v1198_v23 = vmul.f32 -1.442695, %v368_v17  ;;  %v533_v24 = vadd.f32 %v532_v22, %v1841_v3 }
  0xec   : > { %1448 = vpow2.f32 %v1197_v16  ;;  %v1199_v25 = vmul.f32 -1.442695, %v370_v20  ;;  %v373_v26 = vpop.f32.mrb[4].mxu0  ;;  %v1206_v27 = vmul.f32 -1.442695, %v538_v21 }
  0xed   : > { %1450 = vpow2.f32 %v1198_v23  ;;  %v374_v28 = vadd.f32 %v373_v26, %v1837_v1  ;;  %v375_v29 = vpop.f32.mrb[5].mxu0  ;;  %v1203_v30 = vmul.f32 -1.442695, %v533_v24  ;;  %v1313_v31 = vpop.f32.mrb[4].mxu1 }
  0xee   : > { %1452 = vpow2.f32 %v1199_v25  ;;  %v376_v32 = vadd.f32 %v375_v29, %v1839_v2  ;;  %v548_v33 = vadd.f32 %v1313_v31, %v1841_v3  ;;  %v542_v34 = vpop.f32.mrb[5].mxu1 }
  0xef   : > { %v1201_v35 = vmul.f32 -1.442695, %v374_v28  ;;  %1454 = vpow2.f32 %v1206_v27  ;;  %v543_v36 = vadd.f32 %v542_v34, %v1841_v3 }
  0xf0   : > { %v1202_v37 = vmul.f32 -1.442695, %v376_v32  ;;  %1456 = vpow2.f32 %v1203_v30  ;;  %v379_v38 = vpop.f32.mrb[6].mxu0  ;;  %v1212_v39 = vmul.f32 -1.442695, %v548_v33 }
  0xf1   : > { %1458 = vpow2.f32 %v1201_v35  ;;  %v380_v40 = vadd.f32 %v379_v38, %v1837_v1  ;;  %v381_v41 = vpop.f32.mrb[7].mxu0  ;;  %v1209_v42 = vmul.f32 -1.442695, %v543_v36  ;;  %v1856_v43 = vpop.f32.mrb[6].mxu1 }
  0xf2   : > { %1460 = vpow2.f32 %v1202_v37  ;;  %v1858_v44 = vpop.f32.mrb[7].mxu1  ;;  %v382_v61 = vadd.f32 %v381_v41, %v1839_v2  ;;  %v558_v38 = vadd.f32 %v1856_v43, %v1841_v3 }
  0xf3   : > { %v1443_v45 = vpop.eup %1442  ;;  %v1204_v46 = vmul.f32 -1.442695, %v380_v40  ;;  %1462 = vpow2.f32 %v1212_v39 }
  0xf4   : > { %v1445_v47 = vpop.eup %1444  ;;  %v745_v48 = vadd.f32 1.0, %v1443_v45  ;;  %v385_v49 = vpop.f32.mrb[8].mxu0  ;;  %1464 = vpow2.f32 %v1209_v42  ;;  %v1205_v15 = vmul.f32 -1.442695, %v382_v61 }
  0xf5   : > { %v1447_v50 = vpop.eup %1446  ;;  %v746_v51 = vadd.f32 1.0, %v1445_v47  ;;  %1466 = vpow2.f32 %v1204_v46  ;;  %v387_v52 = vpop.f32.mrb[9].mxu0  ;;  %v386_v4 = vadd.f32 %v385_v49, %v1837_v1 }
  0xf6   : > { %v1860_v53 = vpop.f32.mrb[8].mxu1  ;;  %v1449_v54 = vpop.eup %1448  ;;  %1468 = vrcp.f32 %v745_v48  ;;  %v750_v55 = vadd.f32 1.0, %v1447_v50  ;;  %v388_v12 = vadd.f32 %v387_v52, %v1839_v2  ;;  %v553_v50 = vadd.f32 %v1858_v44, %v1841_v3 }
  0xf7   : > { %v1862_v56 = vpop.f32.mrb[9].mxu1  ;;  %v1451_v57 = vpop.eup %1450  ;;  %1470 = vrcp.f32 %v746_v51  ;;  %v747_v58 = vadd.f32 1.0, %v1449_v54  ;;  %v1207_v19 = vmul.f32 -1.442695, %v386_v4 }
  0xf8   : > { %v1453_v59 = vpop.eup %1452  ;;  %1472 = vrcp.f32 %v750_v55  ;;  %v748_v60 = vadd.f32 1.0, %v1451_v57  ;;  %v391_v62 = vpop.f32.mrb[10].mxu0  ;;  %v1208_v27 = vmul.f32 -1.442695, %v388_v12 }
  0xf9   : > { %v1455_v63 = vpop.eup %1454  ;;  %1474 = vrcp.f32 %v747_v58  ;;  %v749_v0 = vadd.f32 1.0, %v1453_v59  ;;  %v393_v5 = vpop.f32.mrb[11].mxu0  ;;  %v392_v23 = vadd.f32 %v391_v62, %v1837_v1  ;;  %v1218_v62 = vmul.f32 -1.442695, %v558_v38 }
  0xfa   : > { %v1866_v6 = vpop.f32.mrb[10].mxu1  ;;  %v1457_v7 = vpop.eup %1456  ;;  %1476 = vrcp.f32 %v748_v60  ;;  %v756_v8 = vadd.f32 1.0, %v1455_v63  ;;  %v394_v28 = vadd.f32 %v393_v5, %v1839_v2 }
  0xfb   : > { %v1868_v9 = vpop.f32.mrb[11].mxu1  ;;  %v1459_v10 = vpop.eup %1458  ;;  %1478 = vrcp.f32 %v749_v0  ;;  %v753_v11 = vadd.f32 1.0, %v1457_v7  ;;  %v1210_v42 = vmul.f32 -1.442695, %v392_v23  ;;  %v1215_v0 = vmul.f32 -1.442695, %v553_v50 }
  0xfc   : > { %v1461_v13 = vpop.eup %1460  ;;  %v751_v14 = vadd.f32 1.0, %v1459_v10  ;;  %1480 = vrcp.f32 %v756_v8  ;;  %v397_v16 = vpop.f32.mrb[12].mxu0  ;;  %v1211_v49 = vmul.f32 -1.442695, %v394_v28 }
  0xfd   : > { %v1463_v17 = vpop.eup %1462  ;;  %v752_v18 = vadd.f32 1.0, %v1461_v13  ;;  %1482 = vrcp.f32 %v753_v11  ;;  %v399_v20 = vpop.f32.mrb[13].mxu0  ;;  %v398_v33 = vadd.f32 %v397_v16, %v1837_v1 }
  0xfe   : > { %v1325_v21 = vpop.f32.mrb[12].mxu1  ;;  %v1465_v22 = vpop.eup %1464  ;;  %1484 = vrcp.f32 %v751_v14  ;;  %v762_v32 = vadd.f32 1.0, %v1463_v17  ;;  %v400_v37 = vadd.f32 %v399_v20, %v1839_v2 }
  0xff   : > { %v1873_v24 = vadd.f32 %v1325_v21, %v1841_v3  ;;  %v582_v25 = vpop.f32.mrb[13].mxu1  ;;  %v1467_v26 = vpop.eup %1466  ;;  %1486 = vrcp.f32 %v752_v18  ;;  %v759_v36 = vadd.f32 1.0, %v1465_v22  ;;  %v1213_v52 = vmul.f32 -1.442695, %v398_v33 }
 0x100   : > { %v1877_v29 = vadd.f32 %v582_v25, %v1841_v3  ;;  %v1469_v30 = vpop.eup %1468  ;;  %v754_v31 = vadd.f32 1.0, %v1467_v26  ;;  %1488 = vpow2.f32 %v1205_v15  ;;  %v403_v34 = vpop.f32.mrb[14].mxu0  ;;  %v1214_v59 = vmul.f32 -1.442695, %v400_v37 }
 0x101   : > { %v1471_v35 = vpop.eup %1470  ;;  %1490 = vpow2.f32 %v1207_v19  ;;  %v405_v39 = vpop.f32.mrb[15].mxu0  ;;  %v404_v54 = vadd.f32 %v403_v34, %v1837_v1 }
 0x102   : > { %v1328_v40 = vpop.f32.mrb[14].mxu1  ;;  %v1473_v41 = vpop.eup %1472  ;;  %1492 = vrcp.f32 %v754_v31  ;;  %v889_v45 = vmul.f32 %v1471_v35, %v1469_v30  ;;  %v406_v4 = vadd.f32 %v405_v39, %v1839_v2 }
 0x103   : > { %v1884_v46 = vadd.f32 %v1328_v40, %v1841_v3  ;;  %v592_v47 = vpop.f32.mrb[15].mxu1  ;;  %v1475_v48 = vpop.eup %1474  ;;  %1494 = vpow2.f32 %v1208_v27  ;;  %v1216_v7 = vmul.f32 -1.442695, %v404_v54  ;;  %v568_v40 = vadd.f32 %v1860_v53, %v1841_v3 }
 0x104   : > { %v1889_v51 = vadd.f32 %v592_v47, %v1841_v3  ;;  %v1477_v43 = vpop.eup %1476  ;;  %1496 = vrcp.f32 %v762_v32  ;;  %v409_v55 = vpop.f32.mrb[16].mxu0  ;;  %v905_v57 = vmul.f32 %v1475_v48, %v889_v45  ;;  %v1217_v19 = vmul.f32 -1.442695, %v406_v4 }
 0x105   : > { %v1479_v58 = vpop.eup %1478  ;;  %1498 = vrcp.f32 %v759_v36  ;;  %v411_v60 = vpop.f32.mrb[17].mxu0  ;;  %v410_v12 = vadd.f32 %v409_v55, %v1837_v1  ;;  %v563_v45 = vadd.f32 %v1862_v56, %v1841_v3  ;;  %v578_v4 = vadd.f32 %v1866_v6, %v1841_v3 }
 0x106   : > { %v1892_v61 = vpop.eup %1480  ;;  %1500 = vpow2.f32 %v1210_v42  ;;  %1361 = vmatprep.mubr.f32.mxu1 %v905_v57  ;;  %v890_v44 = vmul.f32 %v1479_v58, %v1477_v43  ;;  %v412_v15 = vadd.f32 %v411_v60, %v1839_v2  ;;  %v1224_v58 = vmul.f32 -1.442695, %v568_v40 }
 0x107   : > { %v1483_v63 = vpop.eup %1482  ;;  %1502 = vpow2.f32 %v1211_v49  ;;  %v1219_v26 = vmul.f32 -1.442695, %v410_v12 }
 0x108   : > { %v1485_v5 = vpop.eup %1484  ;;  %1504 = vpow2.f32 %v1213_v52  ;;  %v415_v8 = vpop.f32.mrb[18].mxu0  ;;  %v906_v10 = vmul.f32 %v1473_v41, %v890_v44  ;;  %v1220_v31 = vmul.f32 -1.442695, %v412_v15 }
 0x109   : > { %v1487_v11 = vpop.eup %1486  ;;  %1506 = vpow2.f32 %v1214_v59  ;;  %v417_v13 = vpop.f32.mrb[19].mxu0  ;;  %v416_v52 = vadd.f32 %v415_v8, %v1837_v1 }
 0x10a   : > { %v1489_v14 = vpop.eup %1488  ;;  %1508 = vpow2.f32 %v1218_v62  ;;  %1362 = vmatmul.mubr.f32.vlgmr.msra.gmra.mrb[16].mxu1 %v906_v10  ;;  %v891_v16 = vmul.f32 %v1487_v11, %v1485_v5  ;;  %v1221_v62 = vmul.f32 -1.442695, %v563_v45  ;;  %v418_v44 = vadd.f32 %v417_v13, %v1839_v2 }
 0x10b   : > { %v1491_v17 = vpop.eup %1490  ;;  %v755_v18 = vadd.f32 1.0, %v1489_v14  ;;  %1510 = vpow2.f32 %v1215_v0  ;;  %v1222_v10 = vmul.f32 -1.442695, %v416_v52 }
 0x10c   : > { %v1493_v20 = vpop.eup %1492  ;;  %v757_v21 = vadd.f32 1.0, %v1491_v17  ;;  %1512 = vpow2.f32 %v1216_v7  ;;  %v421_v22 = vpop.f32.mrb[20].mxu0  ;;  %v907_v23 = vmul.f32 %v1483_v63, %v891_v16 }
 0x10d   : > { %v1495_v25 = vpop.eup %1494  ;;  %1514 = vrcp.f32 %v755_v18  ;;  %v423_v27 = vpop.f32.mrb[21].mxu0  ;;  %v422_v0 = vadd.f32 %v421_v22, %v1837_v1  ;;  %v1223_v18 = vmul.f32 -1.442695, %v418_v44 }
 0x10e   : > { %v1897_v28 = vpop.eup %1496  ;;  %1516 = vrcp.f32 %v757_v21  ;;  %v758_v30 = vadd.f32 1.0, %v1495_v25  ;;  %1364 = vmatprep.mubr.f32.mxu1 %v907_v23  ;;  %v424_v11 = vadd.f32 %v423_v27, %v1839_v2 }
 0x10f   : > { %v1899_v32 = vpop.eup %1498  ;;  %1518 = vpow2.f32 %v1217_v19  ;;  %v573_v19 = vadd.f32 %v1868_v9, %v1841_v3  ;;  %v1225_v23 = vmul.f32 -1.442695, %v422_v0 }
 0x110   : > { %v1501_v33 = vpop.eup %1500  ;;  %1520 = vrcp.f32 %v758_v30  ;;  %v427_v34 = vpop.f32.mrb[22].mxu0  ;;  %v1226_v3 = vmul.f32 -1.442695, %v424_v11 }
 0x111   : > { %v1503_v35 = vpop.eup %1502  ;;  %v760_v36 = vadd.f32 1.0, %v1501_v33  ;;  %1522 = vpow2.f32 %v1219_v26  ;;  %v1901_v37 = vpop.f32.mrb[23].mxu0  ;;  %v428_v25 = vadd.f32 %v427_v34, %v1837_v1 }
 0x112   : > { %v1505_v38 = vpop.eup %1504  ;;  %v761_v39 = vadd.f32 1.0, %v1503_v35  ;;  %1524 = vpow2.f32 %v1220_v31  ;;  %v430_v9 = vadd.f32 %v1901_v37, %v1839_v2 }
 0x113   : > { %v1507_v41 = vpop.eup %1506  ;;  %1526 = vrcp.f32 %v760_v36  ;;  %v763_v42 = vadd.f32 1.0, %v1505_v38  ;;  %v1230_v38 = vmul.f32 -1.442695, %v578_v4  ;;  %v1236_v4 = vmul.f32 -1.442695, %v1873_v24 }
 0x114   : > { %v1509_v47 = vpop.eup %1508  ;;  %1528 = vrcp.f32 %v761_v39  ;;  %v764_v48 = vadd.f32 1.0, %v1507_v41  ;;  %v433_v49 = vpop.f32.mrb[24].mxu0  ;;  %v1228_v41 = vmul.f32 -1.442695, %v428_v25 }
 0x115   : > { %v1511_v50 = vpop.eup %1510  ;;  %1530 = vrcp.f32 %v763_v42  ;;  %v768_v43 = vadd.f32 1.0, %v1509_v47  ;;  %v1909_v54 = vadd.f32 %v433_v49, %v1837_v1  ;;  %v435_v55 = vpop.f32.mrb[25].mxu0 }
 0x116   : > { %v1513_v53 = vpop.eup %1512  ;;  %1532 = vrcp.f32 %v764_v48  ;;  %v765_v57 = vadd.f32 1.0, %v1511_v50  ;;  %v1912_v59 = vadd.f32 %v435_v55, %v1839_v2 }
 0x117   : > { %v1515_v56 = vpop.eup %1514  ;;  %1534 = vrcp.f32 %v768_v43  ;;  %v766_v60 = vadd.f32 1.0, %v1513_v53  ;;  %v1229_v43 = vmul.f32 -1.442695, %v430_v9 }
 0x118   : > { %v1517_v63 = vpop.eup %1516  ;;  %1536 = vrcp.f32 %v765_v57  ;;  %v892_v5 = vmul.f32 %v1515_v56, %v1493_v20  ;;  %v439_v7 = vpop.f32.mrb[26].mxu0 }
 0x119   : > { %v1519_v8 = vpop.eup %1518  ;;  %1538 = vrcp.f32 %v766_v60  ;;  %v1920_v12 = vadd.f32 %v439_v7, %v1837_v1  ;;  %v441_v14 = vpop.f32.mrb[27].mxu0 }
 0x11a   : > { %v1521_v15 = vpop.eup %1520  ;;  %v767_v13 = vadd.f32 1.0, %v1519_v8  ;;  %1540 = vpow2.f32 %v1224_v58  ;;  %v908_v16 = vmul.f32 %v1892_v61, %v892_v5  ;;  %v1924_v17 = vadd.f32 %v441_v14, %v1839_v2 }
 0x11b   : > { %v1523_v6 = vpop.eup %1522  ;;  %1542 = vpow2.f32 %v1221_v62  ;;  %v893_v20 = vmul.f32 %v1521_v15, %v1517_v63  ;;  %v1234_v25 = vmul.f32 -1.442695, %v1920_v12 }
 0x11c   : > { %v1525_v21 = vpop.eup %1524  ;;  %1544 = vrcp.f32 %v767_v13  ;;  %v769_v22 = vadd.f32 1.0, %v1523_v6  ;;  %1365 = vmatmul.mubr.f32.gmra.mrb[18].mxu1 %v908_v16  ;;  %v445_v26 = vpop.f32.mrb[28].mxu0 }
 0x11d   : > { %v1527_v27 = vpop.eup %1526  ;;  %v770_v61 = vadd.f32 1.0, %v1525_v21  ;;  %1546 = vpow2.f32 %v1222_v10  ;;  %v909_v30 = vmul.f32 %v1899_v32, %v893_v20  ;;  %v1931_v31 = vadd.f32 %v445_v26, %v1837_v1  ;;  %v447_v33 = vpop.f32.mrb[29].mxu0 }
 0x11e   : > { %v1529_v35 = vpop.eup %1528  ;;  %1548 = vrcp.f32 %v769_v22  ;;  %v1936_v36 = vadd.f32 %v447_v33, %v1839_v2  ;;  %v1227_v32 = vmul.f32 -1.442695, %v573_v19  ;;  %v1233_v21 = vmul.f32 -1.442695, %v1877_v29 }
 0x11f   : > { %v1531_v34 = vpop.eup %1530  ;;  %1550 = vrcp.f32 %v770_v61  ;;  %1367 = vmatprep.mubr.f32.mxu1 %v909_v30  ;;  %v894_v39 = vmul.f32 %v1529_v35, %v1527_v27  ;;  %v1235_v61 = vmul.f32 -1.442695, %v1924_v17  ;;  %v1242_v17 = vmul.f32 -1.442695, %v1884_v46 }
 0x120   : > { %v1533_v40 = vpop.eup %1532  ;;  %1552 = vpow2.f32 %v1223_v18  ;;  %v451_v42 = vpop.f32.mrb[30].mxu0  ;;  %v1238_v12 = vmul.f32 -1.442695, %v1936_v36 }
 0x121   : > { %v1535_v45 = vpop.eup %1534  ;;  %1554 = vpow2.f32 %v1225_v23  ;;  %v910_v47 = vmul.f32 %v1897_v28, %v894_v39  ;;  %v895_v48 = vmul.f32 %v1533_v40, %v1531_v34  ;;  %v1940_v37 = vadd.f32 %v451_v42, %v1837_v1  ;;  %v453_v49 = vpop.f32.mrb[31].mxu0 }
 0x122   : > { %v1537_v50 = vpop.eup %1536  ;;  %1556 = vpow2.f32 %v1226_v3  ;;  %v1943_v52 = vadd.f32 %v453_v49, %v1839_v2  ;;  %v1231_v28 = vmul.f32 -1.442695, %v1909_v54  ;;  %v1232_v2 = vmul.f32 -1.442695, %v1912_v59 }
 0x123   : > { %v1539_v55 = vpop.eup %1538  ;;  %1558 = vpow2.f32 %v1230_v38  ;;  %1368 = vmatmul.mubr.f32.gmra.mrb[20].mxu1 %v910_v47  ;;  %v911_v53 = vmul.f32 %v1537_v50, %v895_v48  ;;  %v1237_v34 = vmul.f32 -1.442695, %v1931_v31 }
 0x124   : > { %v1541_v57 = vpop.eup %1540  ;;  %1560 = vpow2.f32 %v1227_v32  ;;  %v1241_v31 = vmul.f32 -1.442695, %v1943_v52 }
 0x125   : > { %v1543_v58 = vpop.eup %1542  ;;  %v774_v56 = vadd.f32 1.0, %v1541_v57  ;;  %1562 = vpow2.f32 %v1228_v41  ;;  %1370 = vmatprep.mubr.f32.mxu1 %v911_v53  ;;  %v1239_v41 = vmul.f32 -1.442695, %v1889_v51 }
 0x126   : > { %v1545_v1 = vpop.eup %1544  ;;  %v771_v60 = vadd.f32 1.0, %v1543_v58  ;;  %1564 = vpow2.f32 %v1229_v43 }
 0x127   : > { %v1547_v62 = vpop.eup %1546  ;;  %1566 = vrcp.f32 %v774_v56  ;;  %v896_v44 = vmul.f32 %v1545_v1, %v1539_v55 }
 0x128   : > { %v1549_v63 = vpop.eup %1548  ;;  %1568 = vrcp.f32 %v771_v60  ;;  %v772_v0 = vadd.f32 1.0, %v1547_v62 }
 0x129   : > { %v1551_v5 = vpop.eup %1550  ;;  %1570 = vpow2.f32 %v1231_v28  ;;  %v912_v7 = vmul.f32 %v1535_v45, %v896_v44  ;;  %v1240_v45 = vmul.f32 -1.442695, %v1940_v37 }
 0x12a   : > { %v1553_v8 = vpop.eup %1552  ;;  %1572 = vrcp.f32 %v772_v0  ;;  %v897_v54 = vmul.f32 %v1551_v5, %v1549_v63 }
 0x12b   : > { %v1555_v10 = vpop.eup %1554  ;;  %v773_v11 = vadd.f32 1.0, %v1553_v8  ;;  %1574 = vpow2.f32 %v1232_v2  ;;  %1371 = vmatmul.mubr.f32.gmra.mrb[22].mxu1 %v912_v7 }
 0x12c   : > { %v1557_v14 = vpop.eup %1556  ;;  %v775_v15 = vadd.f32 1.0, %v1555_v10  ;;  %1576 = vpow2.f32 %v1236_v4 }
 0x12d   : > { %v1559_v59 = vpop.eup %1558  ;;  %1578 = vrcp.f32 %v773_v11  ;;  %v776_v13 = vadd.f32 1.0, %v1557_v14 }
 0x12e   : > { %v1561_v16 = vpop.eup %1560  ;;  %1580 = vrcp.f32 %v775_v15  ;;  %v780_v6 = vadd.f32 1.0, %v1559_v59 }
 0x12f   : > { %v1563_v24 = vpop.eup %1562  ;;  %1582 = vrcp.f32 %v776_v13  ;;  %v777_v18 = vadd.f32 1.0, %v1561_v16 }
 0x130   : > { %v1565_v19 = vpop.eup %1564  ;;  %1584 = vrcp.f32 %v780_v6  ;;  %v778_v20 = vadd.f32 1.0, %v1563_v24 }
 0x131   : > { %v1567_v22 = vpop.eup %1566  ;;  %1586 = vrcp.f32 %v777_v18  ;;  %v779_v23 = vadd.f32 1.0, %v1565_v19 }
 0x132   : > { %v1569_v26 = vpop.eup %1568  ;;  %1588 = vrcp.f32 %v778_v20 }
 0x133   : > { %v1571_v27 = vpop.eup %1570  ;;  %1590 = vrcp.f32 %v779_v23  ;;  %v913_v30 = vmul.f32 %v1569_v26, %v897_v54 }
 0x134   : > { %v1573_v33 = vpop.eup %1572  ;;  %v781_v35 = vadd.f32 1.0, %v1571_v27  ;;  %1592 = vpow2.f32 %v1233_v21 }
 0x135   : > { %v1575_v3 = vpop.eup %1574  ;;  %1594 = vpow2.f32 %v1234_v25  ;;  %1373 = vmatprep.mubr.f32.mxu1 %v913_v30 }
 0x136   : > { %v1577_v9 = vpop.eup %1576  ;;  %1596 = vrcp.f32 %v781_v35  ;;  %v782_v29 = vadd.f32 1.0, %v1575_v3 }
 0x137   : > { %v1579_v38 = vpop.eup %1578  ;;  %1598 = vpow2.f32 %v1235_v61  ;;  %v786_v53 = vadd.f32 1.0, %v1577_v9 }
 0x138   : > { %v1581_v39 = vpop.eup %1580  ;;  %1600 = vrcp.f32 %v782_v29  ;;  %v898_v40 = vmul.f32 %v1579_v38, %v1573_v33 }
 0x139   : > { %v1583_v32 = vpop.eup %1582  ;;  %1602 = vpow2.f32 %v1237_v34 }
 0x13a   : > { %v1585_v42 = vpop.eup %1584  ;;  %v914_v47 = vmul.f32 %v1567_v22, %v898_v40  ;;  %v899_v48 = vmul.f32 %v1583_v32, %v1581_v39  ;;  %1604 = vpow2.f32 %v1238_v12 }
 0x13b   : > { %v1587_v49 = vpop.eup %1586  ;;  %1606 = vpow2.f32 %v1242_v17 }
 0x13c   : > { %v1589_v50 = vpop.eup %1588  ;;  %1374 = vmatmul.mubr.f32.gmra.mrb[24].mxu1 %v914_v47  ;;  %v915_v36 = vmul.f32 %v1587_v49, %v899_v48  ;;  %1608 = vpow2.f32 %v1239_v41 }
 0x13d   : > { %v1591_v43 = vpop.eup %1590  ;;  %1610 = vpow2.f32 %v1240_v45 }
 0x13e   : > { %v1593_v46 = vpop.eup %1592  ;;  %1376 = vmatprep.mubr.f32.mxu1 %v915_v36  ;;  %v900_v51 = vmul.f32 %v1591_v43, %v1589_v50  ;;  %1612 = vpow2.f32 %v1241_v31 }
 0x13f   : > { %v1595_v55 = vpop.eup %1594  ;;  %v783_v57 = vadd.f32 1.0, %v1593_v46 }
 0x140   : > { %v1597_v37 = vpop.eup %1596  ;;  %v784_v58 = vadd.f32 1.0, %v1595_v55  ;;  %v916_v56 = vmul.f32 %v1585_v42, %v900_v51 }
 0x141   : > { %v1599_v28 = vpop.eup %1598  ;;  %1614 = vrcp.f32 %v783_v57 }
 0x142   : > { %v1601_v52 = vpop.eup %1600  ;;  %1616 = vrcp.f32 %v784_v58  ;;  %v785_v1 = vadd.f32 1.0, %v1599_v28  ;;  %1377 = vmatmul.mubr.f32.gmra.mrb[26].mxu1 %v916_v56 }
 0x143   : > { %1618 = vrcp.f32 %v786_v53  ;;  %v901_v60 = vmul.f32 %v1601_v52, %v1597_v37  ;;  %v1603_v62 = vpop.eup %1602 }
 0x144   : > { %1620 = vrcp.f32 %v785_v1  ;;  %v1605_v2 = vpop.eup %1604  ;;  %v787_v44 = vadd.f32 1.0, %v1603_v62 }
 0x145   : > { %v1607_v63 = vpop.eup %1606  ;;  %v788_v0 = vadd.f32 1.0, %v1605_v2 }
 0x146   : > { %v1609_v4 = vpop.eup %1608  ;;  %1622 = vrcp.f32 %v787_v44  ;;  %v792_v10 = vadd.f32 1.0, %v1607_v63 }
 0x147   : > { %v1611_v5 = vpop.eup %1610  ;;  %1624 = vrcp.f32 %v788_v0  ;;  %v789_v7 = vadd.f32 1.0, %v1609_v4 }
 0x148   : > { %v1613_v8 = vpop.eup %1612  ;;  %v790_v54 = vadd.f32 1.0, %v1611_v5 }
 0x149   : > { %1626 = vrcp.f32 %v789_v7  ;;  %v791_v11 = vadd.f32 1.0, %v1613_v8 }
 0x14a   : > { %1628 = vrcp.f32 %v790_v54 }
 0x14b   : > { %v1615_v14 = vpop.eup %1614  ;;  %1630 = vrcp.f32 %v791_v11 }
 0x14c   : > { %v1617_v15 = vpop.eup %1616  ;;  %v917_v59 = vmul.f32 %v1615_v14, %v901_v60  ;;  %1632 = vrcp.f32 %v792_v10 }
 0x14d   : > { %v1619_v13 = vpop.eup %1618 }
 0x14e   : > { %v1621_v16 = vpop.eup %1620  ;;  %1379 = vmatprep.mubr.f32.mxu1 %v917_v59 }
 0x14f   : > { %v902_v6 = vmul.f32 %v1621_v16, %v1617_v15 }
 0x150   : > { %v1623_v24 = vpop.eup %1622 }
 0x151   : > { %v918_v18 = vmul.f32 %v1619_v13, %v902_v6  ;;  %v1625_v19 = vpop.eup %1624 }
 0x152   : > { %v903_v20 = vmul.f32 %v1625_v19, %v1623_v24 }
 0x153   : > { %1380 = vmatmul.mubr.f32.gmra.mrb[28].mxu1 %v918_v18  ;;  %v1627_v21 = vpop.eup %1626 }
 0x154   : > { %v1629_v22 = vpop.eup %1628  ;;  %v919_v23 = vmul.f32 %v1627_v21, %v903_v20 }
 0x155   : > { %v1631_v25 = vpop.eup %1630 }
 0x156   : > { %1382 = vmatprep.mubr.f32.mxu1 %v919_v23  ;;  %v904_v26 = vmul.f32 %v1631_v25, %v1629_v22  ;;  %v1633_v27 = vpop.eup %1632 }
 0x158   : > { %v920_v61 = vmul.f32 %v1633_v27, %v904_v26 }
 0x15a   : > { %1383 = vmatmul.mubr.f32.gmra.mrb[30].mxu1 %v920_v61 }
 0x1dd   : > { %v1363_v30 = vpop.f32.mrb[16].mxu1 }
 0x1de   : > { %1083 = vst [vmem:[%s1962_s9 + $0x8] sm:$0xff] %v1363_v30  ;;  %v1003_v33 = vpop.f32.mrb[17].mxu1 }
 0x1df   : > { %1082 = vst [vmem:[%s1962_s9] sm:$0xff] %v1003_v33 }
 0x1ef   : > { %v1366_v35 = vpop.f32.mrb[18].mxu1 }
 0x1f0   : > { %1085 = vst [vmem:[%s1962_s9 + $0x18] sm:$0xff] %v1366_v35  ;;  %v1013_v3 = vpop.f32.mrb[19].mxu1 }
 0x1f1   : > { %1084 = vst [vmem:[%s1962_s9 + $0x10] sm:$0xff] %v1013_v3 }
 0x1f6   : > { %v1369_v9 = vpop.f32.mrb[20].mxu1 }
 0x1f7   : > { %1087 = vst [vmem:[%s1962_s9 + $0x28] sm:$0xff] %v1369_v9  ;;  %v1023_v29 = vpop.f32.mrb[21].mxu1 }
 0x1f8   : > { %1086 = vst [vmem:[%s1962_s9 + $0x20] sm:$0xff] %v1023_v29 }
 0x1fe   : > { %v1372_v34 = vpop.f32.mrb[22].mxu1 }
 0x1ff   : > { %1089 = vst [vmem:[%s1962_s9 + $0x38] sm:$0xff] %v1372_v34  ;;  %v1033_v38 = vpop.f32.mrb[23].mxu1 }
 0x200   : > { %1088 = vst [vmem:[%s1962_s9 + $0x30] sm:$0xff] %v1033_v38 }
 0x20f   : > { %v1375_v12 = vpop.f32.mrb[24].mxu1 }
 0x210   : > { %1091 = vst [vmem:[%s1962_s9 + $0x48] sm:$0xff] %v1375_v12  ;;  %v1043_v39 = vpop.f32.mrb[25].mxu1 }
 0x211   : > { %1090 = vst [vmem:[%s1962_s9 + $0x40] sm:$0xff] %v1043_v39 }
 0x215   : > { %v1378_v17 = vpop.f32.mrb[26].mxu1 }
 0x216   : > { %1093 = vst [vmem:[%s1962_s9 + $0x58] sm:$0xff] %v1378_v17  ;;  %v1053_v40 = vpop.f32.mrb[27].mxu1 }
 0x217   : > { %1092 = vst [vmem:[%s1962_s9 + $0x50] sm:$0xff] %v1053_v40 }
 0x226   : > { %v1381_v32 = vpop.f32.mrb[28].mxu1 }
 0x227   : > { %1095 = vst [vmem:[%s1962_s9 + $0x68] sm:$0xff] %v1381_v32  ;;  %v1063_v41 = vpop.f32.mrb[29].mxu1 }
 0x228   : > { %1094 = vst [vmem:[%s1962_s9 + $0x60] sm:$0xff] %v1063_v41 }
 0x22d   : > { %v1384_v42 = vpop.f32.mrb[30].mxu1 }
 0x22e   : > { %1097 = vst [vmem:[%s1962_s9 + $0x78] sm:$0xff] %v1384_v42  ;;  %v1073_v45 = vpop.f32.mrb[31].mxu1 }
 0x22f   : > { %1096 = vst [vmem:[%s1962_s9 + $0x70] sm:$0xff] %v1073_v45 }
 0x230 PF: > { %s14_s15 = sadd.s32 1, %s1640_s15  }
 0x231   : > { %p11_p4 = scmp.ge.s32.totalorder %s14_s15, 4  }
 0x233   :  { %13 = sbr.rel (!%p11_p4) target bundleno = 1 (0x1), region = 66 }

</bundles_post_ra>
